<compile_context>
chip_gen: v5e
topology: v5e:2x2
jax: 0.10.0
libtpu: 0.0.40
codegen_flags: <defaults>
</compile_context>

<pallas_src>
import functools

import jax
import jax.numpy as jnp
from jax import lax
from jax.experimental import pallas as pl
from jax.experimental.pallas import tpu as pltpu

_NEG = -1.0e30  # "minus infinity" that stays NaN-safe through exp/max arithmetic


def _round_up(v, m):
    return (v + m - 1) // m * m


def _admsoftmax_kernel(lab_ref, x_ref, wt_ref, out_ref,
                       xn_ref, m_scr, l_scr, wfy_scr,
                       *, s, margin, n_valid, n_pad, c_valid, c_pad, tile_c):
    ni = pl.program_id(0)
    ci = pl.program_id(1)
    last_c = pl.num_programs(1) - 1
    tile_n = x_ref.shape[0]
    n_blk = tile_c // 128

    # ---- once per N-tile: normalize rows of x (rsqrt -> EUP), fold in s, reset state ----
    @pl.when(ci == 0)
    def _():
        x = x_ref[...].astype(jnp.float32)
        ssq = jnp.sum(x * x, axis=1, keepdims=True)
        # F.normalize(x, dim=1, eps=1e-12) == x * rsqrt(max(ssq, eps**2)); s folded in here
        inv = s * lax.rsqrt(jnp.maximum(ssq, 1e-24))
        xn_ref[...] = (x * inv).astype(xn_ref.dtype)
        # running max floored at 0 (guards the all-masked-sub-block case for free)
        m_scr[...] = jnp.zeros_like(m_scr)
        l_scr[...] = jnp.zeros_like(l_scr)
        wfy_scr[...] = jnp.zeros_like(wfy_scr)

    # ---- every (N, C) tile: s-scaled logits for this class block + online logsumexp ----
    swf = jnp.dot(xn_ref[...], wt_ref[...],
                  preferred_element_type=jnp.float32)           # (tn, tc) f32, = s * wf

    lab_local = lab_ref[...] - ci * tile_c                      # (tn, 1) int32
    iota = lax.broadcasted_iota(jnp.int32, swf.shape, 1)        # fixed, no per-step add
    onehot = iota == lab_local
    if c_pad == c_valid:
        keep = jnp.logical_not(onehot)                          # no padded classes: skip compare
    else:
        limit = c_valid - ci * tile_c                           # scalar; only last tile masks
        keep = jnp.logical_and(jnp.logical_not(onehot), iota < limit)
    swf_m = jnp.where(keep, swf, _NEG)                          # single select feeds max & exp

    # lane-blocked running state: pure VPU/EUP, no cross-lane (XLU) ops per grid step
    m_prev = m_scr[...]                                         # (tn, 128), >= 0
    tile_max = swf_m[:, 0:128]
    for b in range(1, n_blk):
        tile_max = jnp.maximum(tile_max, swf_m[:, b * 128:(b + 1) * 128])
    m_new = jnp.maximum(m_prev, tile_max)                       # >= 0 (floor via init)

    p_sum = jnp.exp(swf_m[:, 0:128] - m_new)                    # masked entries underflow to 0
    wfy_acc = jnp.where(onehot[:, 0:128], swf[:, 0:128], 0.0)
    for b in range(1, n_blk):
        sl = slice(b * 128, (b + 1) * 128)
        p_sum = p_sum + jnp.exp(swf_m[:, sl] - m_new)
        wfy_acc = wfy_acc + jnp.where(onehot[:, sl], swf[:, sl], 0.0)

    l_scr[...] = jnp.exp(m_prev - m_new) * l_scr[...] + p_sum
    m_scr[...] = m_new
    wfy_scr[...] += wfy_acc                                     # exactly one nonzero hit per valid row

    # ---- finalize this N-tile after the last class block (one cross-lane combine) ----
    @pl.when(ci == last_c)
    def _():
        m_lane = m_scr[...]                                     # (tn, 128)
        m_row = jnp.max(m_lane, axis=1, keepdims=True)          # (tn, 1)
        l_row = jnp.sum(l_scr[...] * jnp.exp(m_lane - m_row), axis=1, keepdims=True)
        wfy = jnp.sum(wfy_scr[...], axis=1, keepdims=True)      # s * wf[i, labels[i]]
        numerator = wfy - s * margin                            # == s*(wf_y - m)
        mx = jnp.maximum(m_row, numerator)
        # log(exp(numerator) + sum_{j != y} exp(s*wf_j)), stabilized
        log_den = mx + jnp.log(jnp.exp(numerator - mx) + l_row * jnp.exp(m_row - mx))
        loss_rows = numerator - log_den                         # (tn, 1)
        if n_pad != n_valid:
            row = lax.broadcasted_iota(jnp.int32, loss_rows.shape, 0) + ni * tile_n
            loss_rows = jnp.where(row < n_valid, loss_rows, 0.0)
        out_ref[...] = -loss_rows


def adm_softmax_loss(x, weight, labels, s=30.0, m=0.4, matmul_dtype=jnp.bfloat16):
    """x: (N, D), weight: (C, D) (torch.nn.Linear layout), labels: (N,) -> scalar loss."""
    n, d = x.shape
    c, d2 = weight.shape
    assert d == d2
    # TODO(synk): PyTorch's runtime label-range asserts are host-side checks, not kernel ops.

    x_itemsize = jnp.dtype(x.dtype).itemsize
    w_itemsize = jnp.dtype(matmul_dtype).itemsize

    # ---- VMEM-aware tile selection (v7x: 64 MiB physical VMEM; v5e/v6e: 128 MiB) ----
    VMEM_BUDGET = 40 << 20      # conservative working-set target, fits every generation
    X_SHARE = 16 << 20          # x input block (double-buffered) + cached normalized x

    # Large N tiles slash the dominant HBM term (W^T is re-streamed once per N tile);
    # with grid[0] == 1 the weight matrix is streamed exactly once.
    tn = min(512, _round_up(n, 8))
    while tn > 8 and (2 * tn * d * x_itemsize + tn * d * w_itemsize) > X_SHARE:
        tn = max(8, _round_up(tn // 2, 8))
    n_pad = _round_up(n, tn)
    # Keep >= 2 tiles on the "parallel" N axis when possible so both v7x TensorCores get work.
    if n_pad // tn == 1 and n_pad >= 16:
        tn_half = _round_up(n_pad // 2, 8)
        if n_pad % tn_half == 0:
            tn = tn_half

    c_pad = _round_up(c, 128)
    used = 2 * tn * d * x_itemsize + tn * d * w_itemsize + 3 * tn * 128 * 4 + (1 << 20)
    w_share = max(VMEM_BUDGET - used, 2 * d * 128 * w_itemsize)
    tc = 128
    for cand in (512, 256):
        if c_pad % cand == 0 and 2 * d * cand * w_itemsize <= w_share:
            tc = cand
            break
    # TODO(synk): if profiling shows exposed W DMA for very small D, add
    #             pipeline_mode=pl.Buffered(3) to the W^T BlockSpec below.

    xp = x if n_pad == n else jnp.zeros((n_pad, d), x.dtype).at[:n].set(x)
    wt = weight.T.astype(matmul_dtype)                  # (D, C): MXU-friendly RHS layout
    wtp = wt if c_pad == c else jnp.zeros((d, c_pad), matmul_dtype).at[:, :c].set(wt)
    lab = jnp.zeros((n_pad, 1), jnp.int32).at[:n, 0].set(labels.astype(jnp.int32))

    grid = (n_pad // tn, c_pad // tc)

    kernel = functools.partial(
        _admsoftmax_kernel,
        s=float(s), margin=float(m),
        n_valid=n, n_pad=n_pad, c_valid=c, c_pad=c_pad, tile_c=tc)

    cost = pl.CostEstimate(
        flops=int(2 * n_pad * c_pad * d),
        transcendentals=int(n_pad * c_pad),
        bytes_accessed=int(n_pad * d * x_itemsize
                           + grid[0] * d * c_pad * w_itemsize
                           + n_pad * 8),
    )

    per_row = pl.pallas_call(
        kernel,
        out_shape=jax.ShapeDtypeStruct((n_pad, 1), jnp.float32),
        grid_spec=pltpu.PrefetchScalarGridSpec(
            num_scalar_prefetch=0,
            grid=grid,
            in_specs=[
                pl.BlockSpec((tn, 1), lambda i, j: (i, 0)),   # labels (per N-tile)
                pl.BlockSpec((tn, d), lambda i, j: (i, 0)),   # x rows (per N-tile)
                pl.BlockSpec((d, tc), lambda i, j: (0, j)),   # W^T class block (streamed)
            ],
            out_specs=pl.BlockSpec((tn, 1), lambda i, j: (i, 0)),
            scratch_shapes=[
                pltpu.VMEM((tn, d), matmul_dtype),    # cached, s-scaled, normalized x
                pltpu.VMEM((tn, 128), jnp.float32),   # lane-blocked running max
                pltpu.VMEM((tn, 128), jnp.float32),   # lane-blocked running sum
                pltpu.VMEM((tn, 128), jnp.float32),   # lane-blocked target-logit acc
            ]),
        compiler_params=pltpu.CompilerParams(
            dimension_semantics=("parallel", "arbitrary"),
            vmem_limit_bytes=48 << 20),
        cost_estimate=cost,
    )(lab, xp, wtp)

    return jnp.sum(per_row) / n


def _reference(x, weight, labels, s=30.0, m=0.4):
    # pure-JAX reference mirroring the PyTorch forward (f32 throughout)
    xn = x / jnp.maximum(jnp.linalg.norm(x, axis=1, keepdims=True), 1e-12)
    wf = xn @ weight.T
    wf_y = jnp.take_along_axis(wf, labels[:, None], axis=1)[:, 0]
    numerator = s * (wf_y - m)
    onehot = jax.nn.one_hot(labels, weight.shape[0], dtype=bool)
    excl_sum = jnp.sum(jnp.where(onehot, 0.0, jnp.exp(s * wf)), axis=1)
    denom = jnp.exp(numerator) + excl_sum
    L = numerator - jnp.log(denom)
    return -jnp.mean(L)


if __name__ == "__main__":
    in_features = 32
    out_features = 16
    batch = 8

    key = jax.random.PRNGKey(0)
    kx, kw, kl = jax.random.split(key, 3)
    x = jax.random.normal(kx, (batch, in_features), dtype=jnp.float32)
    # deterministic synthetic weight for nn.Linear(in_features, out_features, bias=False)
    bound = 1.0 / (in_features ** 0.5)
    weight = jax.random.uniform(
        kw, (out_features, in_features), minval=-bound, maxval=bound, dtype=jnp.float32
    )
    labels = jax.random.randint(kl, (batch,), 0, out_features, dtype=jnp.int32)

    # default fast path: bf16 MXU operands, f32 accumulation / logsumexp
    loss_fast = jax.block_until_ready(adm_softmax_loss(x, weight, labels, s=30.0, m=0.4))
    # full-f32 path for a tight numerical check against the reference
    loss_f32 = jax.block_until_ready(
        adm_softmax_loss(x, weight, labels, s=30.0, m=0.4, matmul_dtype=jnp.float32))

    ref = _reference(x, weight, labels, s=30.0, m=0.4)
    assert jnp.allclose(loss_f32, ref, rtol=2e-5, atol=2e-5), (loss_f32, ref)
    assert jnp.allclose(loss_fast, ref, rtol=5e-2, atol=5e-2), (loss_fast, ref)

    print("KERNEL_OK")
</pallas_src>

<mosaic_0001>
module attributes {stable_mosaic.version = 11 : i64} {
  func.func @_admsoftmax_kernel(%arg0: i32, %arg1: i32, %arg2: memref<8x1xi32, #tpu.memory_space<vmem>>, %arg3: memref<8x32xf32, #tpu.memory_space<vmem>>, %arg4: memref<32x128xbf16, #tpu.memory_space<vmem>>, %arg5: memref<8x1xf32, #tpu.memory_space<vmem>>, %arg6: memref<8x32xbf16, #tpu.memory_space<vmem>>, %arg7: memref<8x128xf32, #tpu.memory_space<vmem>>, %arg8: memref<8x128xf32, #tpu.memory_space<vmem>>, %arg9: memref<8x128xf32, #tpu.memory_space<vmem>>) attributes {dimension_semantics = [#tpu.dimension_semantics<parallel>, #tpu.dimension_semantics<arbitrary>], iteration_bounds = array<i64: 1, 1>, scalar_prefetch = 0 : i64, scratch_operands = 4 : i64, tpu.core_type = #tpu.core_type<tc>, window_params = [{transform_indices = @transform_0, window_bounds = array<i64: 8, 1>}, {transform_indices = @transform_1, window_bounds = array<i64: 8, 32>}, {transform_indices = @transform_2, window_bounds = array<i64: 32, 128>}, {transform_indices = @transform_3, window_bounds = array<i64: 8, 1>}]} {
    %c0_i32 = arith.constant 0 : i32
    %0 = arith.cmpi eq, %arg1, %c0_i32 : i32
    %1 = arith.extui %0 : i1 to i32
    %c0_i32_0 = arith.constant 0 : i32
    %2 = arith.cmpi ne, %1, %c0_i32_0 : i32
    scf.if %2 {
      %c0_24 = arith.constant 0 : index
      %c0_25 = arith.constant 0 : index
      %40 = vector.load %arg3[%c0_24, %c0_25] : memref<8x32xf32, #tpu.memory_space<vmem>>, vector<8x32xf32>
      %41 = arith.mulf %40, %40 : vector<8x32xf32>
      %cst_26 = arith.constant dense<0.000000e+00> : vector<8xf32>
      %42 = vector.multi_reduction <add>, %41, %cst_26 [1] : vector<8x32xf32> to vector<8xf32>
      %43 = vector.shape_cast %42 : vector<8xf32> to vector<8x1xf32>
      %cst_27 = arith.constant 1.000000e-24 : f32
      %44 = vector.broadcast %cst_27 : f32 to vector<8x1xf32>
      %45 = arith.maximumf %43, %44 : vector<8x1xf32>
      %46 = math.rsqrt %45 : vector<8x1xf32>
      %cst_28 = arith.constant 3.000000e+01 : f32
      %47 = vector.broadcast %cst_28 : f32 to vector<8x1xf32>
      %48 = arith.mulf %47, %46 : vector<8x1xf32>
      %49 = vector.broadcast %48 : vector<8x1xf32> to vector<8x32xf32>
      %50 = arith.mulf %40, %49 : vector<8x32xf32>
      %51 = arith.truncf %50 : vector<8x32xf32> to vector<8x32xbf16>
      %c0_29 = arith.constant 0 : index
      %c0_30 = arith.constant 0 : index
      %52 = vector.load %arg6[%c0_29, %c0_30] : memref<8x32xbf16, #tpu.memory_space<vmem>>, vector<8x32xbf16>
      tpu.vector_store %arg6[%c0_29, %c0_30], %51 {strides = array<i32>} : memref<8x32xbf16, #tpu.memory_space<vmem>>, vector<8x32xbf16>,
      %cst_31 = arith.constant 0.000000e+00 : f32
      %53 = vector.broadcast %cst_31 : f32 to vector<8x128xf32>
      %c0_32 = arith.constant 0 : index
      %c0_33 = arith.constant 0 : index
      %54 = vector.load %arg7[%c0_32, %c0_33] : memref<8x128xf32, #tpu.memory_space<vmem>>, vector<8x128xf32>
      tpu.vector_store %arg7[%c0_32, %c0_33], %53 {strides = array<i32>} : memref<8x128xf32, #tpu.memory_space<vmem>>, vector<8x128xf32>,
      %cst_34 = arith.constant 0.000000e+00 : f32
      %55 = vector.broadcast %cst_34 : f32 to vector<8x128xf32>
      %c0_35 = arith.constant 0 : index
      %c0_36 = arith.constant 0 : index
      %56 = vector.load %arg8[%c0_35, %c0_36] : memref<8x128xf32, #tpu.memory_space<vmem>>, vector<8x128xf32>
      tpu.vector_store %arg8[%c0_35, %c0_36], %55 {strides = array<i32>} : memref<8x128xf32, #tpu.memory_space<vmem>>, vector<8x128xf32>,
      %cst_37 = arith.constant 0.000000e+00 : f32
      %57 = vector.broadcast %cst_37 : f32 to vector<8x128xf32>
      %c0_38 = arith.constant 0 : index
      %c0_39 = arith.constant 0 : index
      %58 = vector.load %arg9[%c0_38, %c0_39] : memref<8x128xf32, #tpu.memory_space<vmem>>, vector<8x128xf32>
      tpu.vector_store %arg9[%c0_38, %c0_39], %57 {strides = array<i32>} : memref<8x128xf32, #tpu.memory_space<vmem>>, vector<8x128xf32>,
    } else {
    }
    %c0 = arith.constant 0 : index
    %c0_1 = arith.constant 0 : index
    %3 = vector.load %arg6[%c0, %c0_1] : memref<8x32xbf16, #tpu.memory_space<vmem>>, vector<8x32xbf16>
    %c0_2 = arith.constant 0 : index
    %c0_3 = arith.constant 0 : index
    %4 = vector.load %arg4[%c0_2, %c0_3] : memref<32x128xbf16, #tpu.memory_space<vmem>>, vector<32x128xbf16>
    %cst = arith.constant dense<0.000000e+00> : vector<8x128xf32>
    %5 = tpu.matmul %3, %4, %cst {dimension_numbers = #tpu.dot_dimension_numbers<[1], [0], [0], [1], [0, 0, 1, 1], [], []>} : vector<8x32xbf16>, vector<32x128xbf16>, vector<8x128xf32> -> vector<8x128xf32>
    %c0_4 = arith.constant 0 : index
    %c0_5 = arith.constant 0 : index
    %6 = vector.load %arg2[%c0_4, %c0_5] : memref<8x1xi32, #tpu.memory_space<vmem>>, vector<8x1xi32>
    %c128_i32 = arith.constant 128 : i32
    %7 = arith.muli %arg1, %c128_i32 : i32
    %8 = vector.broadcast %7 : i32 to vector<8x1xi32>
    %9 = arith.subi %6, %8 : vector<8x1xi32>
    %10 = tpu.iota {dimensions = array<i32: 1>} : vector<8x128xi32>
    %11 = vector.broadcast %9 : vector<8x1xi32> to vector<8x128xi32>
    %12 = arith.cmpi eq, %10, %11 : vector<8x128xi32>
    %c128_i32_6 = arith.constant 128 : i32
    %13 = arith.muli %arg1, %c128_i32_6 : i32
    %c16_i32 = arith.constant 16 : i32
    %14 = arith.subi %c16_i32, %13 : i32
    %cst_7 = arith.constant dense<true> : vector<8x128xi1>
    %15 = arith.xori %12, %cst_7 : vector<8x128xi1>
    %16 = vector.broadcast %14 : i32 to vector<8x128xi32>
    %17 = arith.cmpi slt, %10, %16 : vector<8x128xi32>
    %18 = arith.andi %15, %17 : vector<8x128xi1>
    %cst_8 = arith.constant -1.000000e+30 : f32
    %19 = vector.broadcast %cst_8 : f32 to vector<8x128xf32>
    %20 = arith.select %18, %5, %19 : vector<8x128xi1>, vector<8x128xf32>
    %c0_9 = arith.constant 0 : index
    %c0_10 = arith.constant 0 : index
    %21 = vector.load %arg7[%c0_9, %c0_10] : memref<8x128xf32, #tpu.memory_space<vmem>>, vector<8x128xf32>
    %22 = arith.maximumf %21, %20 : vector<8x128xf32>
    %23 = arith.subf %20, %22 : vector<8x128xf32>
    %24 = math.exp %23 : vector<8x128xf32>
    %cst_11 = arith.constant 0.000000e+00 : f32
    %25 = vector.broadcast %cst_11 : f32 to vector<8x128xf32>
    %26 = arith.select %12, %5, %25 : vector<8x128xi1>, vector<8x128xf32>
    %27 = arith.subf %21, %22 : vector<8x128xf32>
    %28 = math.exp %27 : vector<8x128xf32>
    %c0_12 = arith.constant 0 : index
    %c0_13 = arith.constant 0 : index
    %29 = vector.load %arg8[%c0_12, %c0_13] : memref<8x128xf32, #tpu.memory_space<vmem>>, vector<8x128xf32>
    %30 = arith.mulf %28, %29 : vector<8x128xf32>
    %31 = arith.addf %30, %24 : vector<8x128xf32>
    %c0_14 = arith.constant 0 : index
    %c0_15 = arith.constant 0 : index
    %32 = vector.load %arg8[%c0_14, %c0_15] : memref<8x128xf32, #tpu.memory_space<vmem>>, vector<8x128xf32>
    tpu.vector_store %arg8[%c0_14, %c0_15], %31 {strides = array<i32>} : memref<8x128xf32, #tpu.memory_space<vmem>>, vector<8x128xf32>,
    %c0_16 = arith.constant 0 : index
    %c0_17 = arith.constant 0 : index
    %33 = vector.load %arg7[%c0_16, %c0_17] : memref<8x128xf32, #tpu.memory_space<vmem>>, vector<8x128xf32>
    tpu.vector_store %arg7[%c0_16, %c0_17], %22 {strides = array<i32>} : memref<8x128xf32, #tpu.memory_space<vmem>>, vector<8x128xf32>,
    %c0_18 = arith.constant 0 : index
    %c0_19 = arith.constant 0 : index
    %34 = vector.load %arg9[%c0_18, %c0_19] : memref<8x128xf32, #tpu.memory_space<vmem>>, vector<8x128xf32>
    %35 = arith.addf %34, %26 : vector<8x128xf32>
    %c0_20 = arith.constant 0 : index
    %c0_21 = arith.constant 0 : index
    %36 = vector.load %arg9[%c0_20, %c0_21] : memref<8x128xf32, #tpu.memory_space<vmem>>, vector<8x128xf32>
    tpu.vector_store %arg9[%c0_20, %c0_21], %35 {strides = array<i32>} : memref<8x128xf32, #tpu.memory_space<vmem>>, vector<8x128xf32>,
    %c0_i32_22 = arith.constant 0 : i32
    %37 = arith.cmpi eq, %arg1, %c0_i32_22 : i32
    %38 = arith.extui %37 : i1 to i32
    %c0_i32_23 = arith.constant 0 : i32
    %39 = arith.cmpi ne, %38, %c0_i32_23 : i32
    scf.if %39 {
      %c0_24 = arith.constant 0 : index
      %c0_25 = arith.constant 0 : index
      %40 = vector.load %arg7[%c0_24, %c0_25] : memref<8x128xf32, #tpu.memory_space<vmem>>, vector<8x128xf32>
      %cst_26 = arith.constant dense<0xFF800000> : vector<8xf32>
      %41 = vector.multi_reduction <maximumf>, %40, %cst_26 [1] : vector<8x128xf32> to vector<8xf32>
      %42 = vector.shape_cast %41 : vector<8xf32> to vector<8x1xf32>
      %c0_27 = arith.constant 0 : index
      %c0_28 = arith.constant 0 : index
      %43 = vector.load %arg8[%c0_27, %c0_28] : memref<8x128xf32, #tpu.memory_space<vmem>>, vector<8x128xf32>
      %44 = vector.broadcast %42 : vector<8x1xf32> to vector<8x128xf32>
      %45 = arith.subf %40, %44 : vector<8x128xf32>
      %46 = math.exp %45 : vector<8x128xf32>
      %47 = arith.mulf %43, %46 : vector<8x128xf32>
      %cst_29 = arith.constant dense<0.000000e+00> : vector<8xf32>
      %48 = vector.multi_reduction <add>, %47, %cst_29 [1] : vector<8x128xf32> to vector<8xf32>
      %49 = vector.shape_cast %48 : vector<8xf32> to vector<8x1xf32>
      %c0_30 = arith.constant 0 : index
      %c0_31 = arith.constant 0 : index
      %50 = vector.load %arg9[%c0_30, %c0_31] : memref<8x128xf32, #tpu.memory_space<vmem>>, vector<8x128xf32>
      %cst_32 = arith.constant dense<0.000000e+00> : vector<8xf32>
      %51 = vector.multi_reduction <add>, %50, %cst_32 [1] : vector<8x128xf32> to vector<8xf32>
      %52 = vector.shape_cast %51 : vector<8xf32> to vector<8x1xf32>
      %cst_33 = arith.constant 1.200000e+01 : f32
      %53 = vector.broadcast %cst_33 : f32 to vector<8x1xf32>
      %54 = arith.subf %52, %53 : vector<8x1xf32>
      %55 = arith.maximumf %42, %54 : vector<8x1xf32>
      %56 = arith.subf %54, %55 : vector<8x1xf32>
      %57 = math.exp %56 : vector<8x1xf32>
      %58 = arith.subf %42, %55 : vector<8x1xf32>
      %59 = math.exp %58 : vector<8x1xf32>
      %60 = arith.mulf %49, %59 : vector<8x1xf32>
      %61 = arith.addf %57, %60 : vector<8x1xf32>
      %62 = math.log %61 : vector<8x1xf32>
      %63 = arith.addf %55, %62 : vector<8x1xf32>
      %64 = arith.subf %54, %63 : vector<8x1xf32>
      %cst_34 = arith.constant 0.000000e+00 : f32
      %65 = vector.broadcast %cst_34 : f32 to vector<8x1xf32>
      %66 = arith.subf %65, %64 : vector<8x1xf32>
      %c0_35 = arith.constant 0 : index
      %c0_36 = arith.constant 0 : index
      %67 = vector.load %arg5[%c0_35, %c0_36] : memref<8x1xf32, #tpu.memory_space<vmem>>, vector<8x1xf32>
      tpu.vector_store %arg5[%c0_35, %c0_36], %66 {strides = array<i32>} : memref<8x1xf32, #tpu.memory_space<vmem>>, vector<8x1xf32>,
    } else {
    }
    return
  }
  func.func @transform_0(%arg0: i32, %arg1: i32) -> (i32, i32) {
    %c0_i32 = arith.constant 0 : i32
    %c0_i32_0 = arith.constant 0 : i32
    return %arg0, %c0_i32 : i32, i32
  }
  func.func @transform_1(%arg0: i32, %arg1: i32) -> (i32, i32) {
    %c0_i32 = arith.constant 0 : i32
    %c0_i32_0 = arith.constant 0 : i32
    return %arg0, %c0_i32 : i32, i32
  }
  func.func @transform_2(%arg0: i32, %arg1: i32) -> (i32, i32) {
    %c0_i32 = arith.constant 0 : i32
    %c0_i32_0 = arith.constant 0 : i32
    return %c0_i32, %arg1 : i32, i32
  }
  func.func @transform_3(%arg0: i32, %arg1: i32) -> (i32, i32) {
    %c0_i32 = arith.constant 0 : i32
    %c0_i32_0 = arith.constant 0 : i32
    return %arg0, %c0_i32 : i32, i32
  }
}

</mosaic_0001>

<bundles_post_ra>
// kernel: tpu_custom_call.1
= control target key start
LH: loop header
LB: loop body
LE: loop exit
PB: predicated region body
PF: predicated region fallthrough
CT: control target
= control target key end

     0   :  { %8 = vsyncpa [#allocation7], 0  ;;  %s223_s15 = smov [#allocation6]   ;;  %s224_s17 = smov 64   ;;  %s262_s0 = inlined_call_operand.vmem [shape: s32[8,1], index: 0, kind: input, shape index: {}]   ;;  %s263_s1 = inlined_call_operand.vmem [shape: f32[8,32], index: 1, kind: input, shape index: {}]   ;;  %s264_s2 = inlined_call_operand.hbm [shape: bf16[32,128], index: 2, kind: input, shape index: {}]   ;;  %s265_s3 = inlined_call_operand.vmem [shape: f32[8,1], index: 3, kind: output, shape index: {}]  }
   0x1   :  { %s17_s14 = sshll.u32 %s264_s2, 4  ;;  %s19_s16 = sshll.u32 %s223_s15, 4  ;;  %s18_s14 = int_to_ptr.hbm [resolvable:$true] %s17_s14  ;;  %s20_s16 = int_to_ptr.vmem [resolvable:$true] %s19_s16 }
   0x2   :  { %s225_s18 = smov 4  }
   0x3   :  { %25 = dma.hbm_to_vmem [thread:$0]  %s18_s14, 256, %s20_s16, [#allocation7], %s224_s17, %s224_s17, %s225_s18  }
   0x4   :  { %221 = dma.done.wait [#allocation7], 256  }
   0x5   :  { %222 = vsyncadd [#allocation7], 4294967040  ;;  %v35_v0 = vld [vmem:[%s263_s1] sm:$0xff]  ;;  %vm37_vm0 = vcmask 261120   ;;  %v176_v3 = vld [vmem:[#allocation6 + $0x8] sm:$0xff]  ;;  %v226_v8 = vmov 0   ;;  %v98_v20 = vlaneseq }
   0x6   :  { %v36_v1 = vmul.f32 %v35_v0, %v35_v0  ;;  %87 = vmatpush.bf16.msra.mxu0 %v176_v3  ;;  %v175_v4 = vld [vmem:[#allocation6] sm:$0xff]  ;;  %182 = vset.pattern.permute.xlu0 %v226_v8  ;;  %vm55_vm4 = vcmask 257024   ;;  %vm227_vm7 = vmmov 1   ;;  %vm158_vm10 = vcmask 7168  }
   0x7   :  { %v94_v7 = vld [vmem:[%s262_s0] sm:$0xff]  ;;  %v99_v21 = vand.u32 127, %v98_v20 }
   0x8   :  { %v38_v2 = vsel %vm37_vm0, %v36_v1, 0.0 }
   0x9   :  { %39 = vadd.xlane.f32.xlu0 %v38_v2  ;;  %vm107_vm6 = vcmp.lt.s32.totalorder %v99_v21, 16 }
   0xa   :  { %88 = vmatpush.bf16.msra.mxu0 %v175_v4 }
  0x1d   :  { %101 = vperm.xlu0 %182, %v94_v7  }
  0x7c   :  { %v40_v5 = vpop.xlane.xlu0 %39 }
  0x7d   :  { %v41_v6 = vmax.f32 %v40_v5, 1e-24 }
  0x7f   :  { %183 = vrsqrt.f32 %v41_v6  ;;  %vm48_vm2 = vweird.f32 %v41_v6 }
  0x85   :  { %v184_v9 = vpop.eup %183 }
  0x86   :  { %v43_v10 = vmul.f32 %v184_v9, %v41_v6  ;;  %vm49_vm1 = vweird.f32 %v184_v9 }
  0x87   :  { %vm50_vm3 = vmor %vm48_vm2, %vm49_vm1 }
  0x88   :  { %v44_v11 = vmul.f32 %v184_v9, %v43_v10 }
  0x8a   :  { %v45_v12 = vmul.f32 0.5, %v44_v11 }
  0x8c   :  { %v46_v13 = vsub.f32 1.5, %v45_v12 }
  0x8e   :  { %v47_v14 = vmul.f32 %v184_v9, %v46_v13 }
  0x8f   :  { %v102_v22 = vpop.permute.xlu0 %101 }
  0x90   :  { %v51_v15 = vsel %vm50_vm3, %v184_v9, %v47_v14  ;;  %vm103_vm5 = vcmp.eq.s32.totalorder %v99_v21, %v102_v22 }
  0x91   :  { %v52_v16 = vmul.f32 30.0, %v51_v15  ;;  %vm105_vm8 = vmxor %vm103_vm5, %vm227_vm7 }
  0x92   :  { %vm108_vm9 = vmand %vm105_vm8, %vm107_vm6 }
  0x93   :  { %v53_v17 = vmul.f32 %v52_v16, %v35_v0 }
  0x95   :  { %v54_v18 = vpack.c.bf16 %v53_v17, %v53_v17 }
  0x97   :  { %56 = vst.msk [vmem:[#allocation2] sm:$0xf] %vm55_vm4, %v54_v18 }
  0x9e   :  { %v60_v19 = vld [vmem:[#allocation2] sm:$0xf] }
  0x9f   :  { %173 = vmatmul.msk.bf16.vlgmr.msra.gmra.mxu0 %vm37_vm0, %v60_v19 }
 0x11c   :  { %v90_v23 = vpop.f32.mrf.mxu0 }
 0x11d   :  { %v109_v24 = vsel %vm108_vm9, %v90_v23, -1e+30  ;;  %v115_v27 = vsel %vm103_vm5, %v90_v23, 0.0 }
 0x11e   :  { %v111_v25 = vmax.f32 %v109_v24, 0.0 }
 0x120   :  { %131 = vmax.xlane.f32.xlu1 %v111_v25  ;;  %v116_v28 = vsub.f32 0.0, %v111_v25  ;;  %v112_v30 = vsub.f32 %v109_v24, %v111_v25 }
 0x122   :  { %v117_v29 = vmul.f32 1.442695, %v116_v28  ;;  %v113_v31 = vmul.f32 1.442695, %v112_v30 }
 0x124   :  { %v92_v26 = vpop.f32.mrf.mxu0  ;;  %185 = vpow2.f32 %v117_v29 }
 0x125   :  { %187 = vpow2.f32 %v113_v31 }
 0x128   :  { %141 = vadd.xlane.f32.xlu1 %v115_v27 }
 0x12a   :  { %v186_v34 = vpop.eup %185 }
 0x12b   :  { %v120_v36 = vmul.f32 0.0, %v186_v34  ;;  %v188_v37 = vpop.eup %187 }
 0x12d   :  { %v121_v38 = vadd.f32 %v188_v37, %v120_v36 }
 0x193   :  { %v132_v32 = vpop.xlane.xlu1 %131 }
 0x194   :  { %v134_v33 = vsub.f32 %v111_v25, %v132_v32 }
 0x196   :  { %v135_v35 = vmul.f32 1.442695, %v134_v33 }
 0x198   :  { %189 = vpow2.f32 %v135_v35 }
 0x19b   :  { %v142_v41 = vpop.xlane.xlu1 %141 }
 0x19c   :  { %v174_v42 = vadd.f32 -12.0, %v142_v41 }
 0x19e   :  { %v190_v39 = vpop.eup %189  ;;  %v144_v43 = vmax.f32 %v132_v32, %v174_v42 }
 0x19f   :  { %v137_v40 = vmul.f32 %v190_v39, %v121_v38 }
 0x1a0   :  { %v148_v44 = vsub.f32 %v132_v32, %v144_v43  ;;  %v145_v45 = vsub.f32 %v174_v42, %v144_v43 }
 0x1a1   :  { %138 = vadd.xlane.f32.xlu2 %v137_v40 }
 0x1a2   :  { %v149_v46 = vmul.f32 1.442695, %v148_v44  ;;  %v146_v47 = vmul.f32 1.442695, %v145_v45 }
 0x1a4   :  { %191 = vpow2.f32 %v149_v46 }
 0x1a5   :  { %193 = vpow2.f32 %v146_v47 }
 0x1aa   :  { %v192_v48 = vpop.eup %191 }
 0x1ab   :  { %v194_v51 = vpop.eup %193 }
 0x214   :  { %v139_v49 = vpop.xlane.xlu2 %138 }
 0x215   :  { %v151_v50 = vmul.f32 %v192_v48, %v139_v49 }
 0x217   :  { %v152_v52 = vadd.f32 %v194_v51, %v151_v50 }
 0x219   :  { %195 = vlog2.f32 %v152_v52 }
 0x21f   :  { %v196_v53 = vpop.eup %195 }
 0x220   :  { %v154_v54 = vmul.f32 0.6931472, %v196_v53 }
 0x222   :  { %v155_v55 = vadd.f32 %v154_v54, %v144_v43 }
 0x224   :  { %v156_v56 = vsub.f32 %v174_v42, %v155_v55 }
 0x226   :  { %v157_v57 = vsub.f32 0.0, %v156_v56 }
 0x228   :  { %159 = vst.msk [vmem:[%s265_s3] sm:$0xff] %vm158_vm10, %v157_v57 }
 0x229   :  { %164 = vsyncpa [#allocation7], 1 }

</bundles_post_ra>
